<compile_context>
chip_gen: v5e
topology: v5e:2x2
jax: 0.10.0
libtpu: 0.0.40
codegen_flags: <defaults>
</compile_context>

<pallas_src>
from enum import Enum
from functools import partial

import jax
import jax.numpy as jnp
from jax.experimental import pallas as pl
from jax.experimental.pallas import tpu as pltpu


# ----------------------------- Pallas kernels ------------------------------ #

def _qdq_kernel(enc_ref, x_ref, o_ref):
    """Learned-grid quantize-dequantize (nearest rounding).

    enc_ref (SMEM, f32[5]) = [inv_delta, offset, qmin, qmax, delta]
        q   = clamp(round(x * inv_delta) - offset, qmin, qmax)
        out = (q + offset) * delta
    """
    inv_delta = enc_ref[0]
    offset = enc_ref[1]
    qmin = enc_ref[2]
    qmax = enc_ref[3]
    delta = enc_ref[4]
    x = x_ref[...].astype(jnp.float32)            # native dtype in HBM, f32 in-register
    q = jnp.clip(jnp.round(x * inv_delta) - offset, qmin, qmax)
    o_ref[...] = ((q + offset) * delta).astype(o_ref.dtype)


def _minmax_kernel(x_ref, min_ref, max_ref):
    """Per-block partial min/max.

    Sublane-only (VPU) reduce; each grid step writes its own lane-dense (8, lanes)
    partial block (no shared accumulator, no output revisit), so the grid axis is
    'parallel' and both v7x TensorCores participate.  The final (tiny) reduce over
    the partials is done in plain JAX.
    """
    x = x_ref[...].astype(jnp.float32)
    mn = jnp.min(x, axis=0, keepdims=True)        # (1, lanes)
    mx = jnp.max(x, axis=0, keepdims=True)
    min_ref[...] = jnp.broadcast_to(mn, min_ref.shape)
    max_ref[...] = jnp.broadcast_to(mx, max_ref.shape)


# --------------------------- tiling / prep helpers -------------------------- #

def _choose_tiles(n):
    """(lanes, block_rows) for a flat length-n tensor.

    Large tensors get big lane-dense tiles (per-grid-step overhead ~0.35us caps
    small-tile throughput at ~30% of HBM roofline; 512-row tiles reach ~85%).
    2 MiB f32 blocks keep double-buffered VMEM use ~8 MiB (safe on v7x's 64 MiB).
    """
    for lanes, brows in ((1024, 512), (1024, 128), (512, 32), (128, 8)):
        if n >= lanes * brows:
            return lanes, brows
    return 128, 8


def _as_tiles(x, lanes, brows):
    """Flatten row-major and reshape to (rows, lanes), zero-padding only if ragged.

    No dtype cast here (native dtype kept through HBM).  Zero padding is safe:
    QDQ outputs in the padded region are sliced off, and min/max stats feed
    encodings that are zero-anchored anyway (TF init + gating logic).
    """
    flat = x.reshape(-1)
    n = flat.shape[0]
    block = lanes * brows
    pad = (-n) % block
    if pad:
        flat = jnp.pad(flat, (0, pad))
    return flat.reshape(-1, lanes), n


# ------------------------------ Pallas wrappers ----------------------------- #

@jax.jit
def _tensor_min_max(x):
    """Observed (min, max) over all elements of `x` (parallel partial reduce)."""
    lanes, brows = _choose_tiles(x.size)
    x2d, _ = _as_tiles(x, lanes, brows)
    num_blocks = x2d.shape[0] // brows
    part_min, part_max = pl.pallas_call(
        _minmax_kernel,
        out_shape=(jax.ShapeDtypeStruct((num_blocks * 8, lanes), jnp.float32),
                   jax.ShapeDtypeStruct((num_blocks * 8, lanes), jnp.float32)),
        grid=(num_blocks,),
        in_specs=[pl.BlockSpec((brows, lanes), lambda i: (i, 0))],
        out_specs=(pl.BlockSpec((8, lanes), lambda i: (i, 0)),
                   pl.BlockSpec((8, lanes), lambda i: (i, 0))),
        compiler_params=pltpu.CompilerParams(
            dimension_semantics=("parallel",)),
    )(x2d)
    return jnp.min(part_min), jnp.max(part_max)


def _encoding_params(enc_min, enc_max, bitwidth, symmetric):
    """delta / offset / clamp range from the (learned) encoding min/max.

    Asymmetric: delta = (max - min) / (2^bw - 1), offset = round(min / delta).
    Symmetric (AIMET non-strict): delta = max(|min|, |max|) / (2^(bw-1) - 1),
    offset = -2^(bw-1)  (dequant grid [-2^(bw-1)*delta, (2^(bw-1)-1)*delta]).
    """
    enc_min = jnp.asarray(enc_min, jnp.float32)
    enc_max = jnp.asarray(enc_max, jnp.float32)
    num_steps = jnp.float32(2.0 ** bitwidth - 1.0)
    if symmetric:
        abs_max = jnp.maximum(jnp.abs(enc_min), jnp.abs(enc_max))
        delta = abs_max / jnp.float32(2.0 ** (bitwidth - 1) - 1.0)
        offset = jnp.float32(-(2.0 ** (bitwidth - 1)))
    else:
        delta = (enc_max - enc_min) / num_steps
        offset = jnp.round(enc_min / delta)
    return delta, offset, jnp.float32(0.0), num_steps


@partial(jax.jit, static_argnames=("bitwidth", "symmetric"))
def _learned_grid_qdq(x, enc_min, enc_max, *, bitwidth, symmetric):
    """Per-tensor fake-quant of `x` with learned encoding (min, max)."""
    delta, offset, qmin, qmax = _encoding_params(enc_min, enc_max, bitwidth, symmetric)
    enc = jnp.stack([1.0 / delta, offset, qmin, qmax, delta]).astype(jnp.float32)
    lanes, brows = _choose_tiles(x.size)
    x2d, n = _as_tiles(x, lanes, brows)
    rows = x2d.shape[0]
    out2d = pl.pallas_call(
        _qdq_kernel,
        out_shape=jax.ShapeDtypeStruct(x2d.shape, x.dtype),   # native dtype out
        grid=(rows // brows,),
        in_specs=[
            pl.BlockSpec(memory_space=pltpu.MemorySpace.SMEM),  # encoding scalars
            pl.BlockSpec((brows, lanes), lambda i: (i, 0)),
        ],
        out_specs=pl.BlockSpec((brows, lanes), lambda i: (i, 0)),
        compiler_params=pltpu.CompilerParams(
            dimension_semantics=("parallel",)),
    )(enc, x2d)
    if out2d.size == n:                       # fast path: pure reshape, no slicing
        return out2d.reshape(x.shape)
    return out2d.reshape(-1)[:n].reshape(x.shape)


# --------------------- Python-side module re-implementation ----------------- #

class QuantizationDataType(Enum):
    int = 1
    float = 2


class QuantScheme(Enum):
    post_training_tf = 1
    post_training_tf_enhanced = 2
    training_range_learning_with_tf_init = 3
    training_range_learning_with_tf_enhanced_init = 4


class QcQuantizeOpMode(Enum):
    PASSTHROUGH = 1
    ANALYSIS = 2
    ACTIVE = 3


class LearnedGridTensorQuantizer:
    """Per-tensor learned-grid quantizer; QDQ runs through the Pallas kernel."""

    def __init__(self, bitwidth, round_mode, quant_scheme, use_symmetric_encodings,
                 enabled_by_default, data_type=QuantizationDataType.int):
        self.bitwidth = bitwidth
        # TODO(synk): only nearest rounding is implemented (no stochastic rounding).
        self.round_mode = round_mode
        self.quant_scheme = quant_scheme
        self.use_symmetric_encodings = use_symmetric_encodings
        self.enabled = enabled_by_default
        self.data_type = data_type
        self.name = None
        self.wrapper_ref = None
        self.device = None

    def quantize_dequantize(self, tensor, encoding_min, encoding_max):
        if not self.enabled:
            return tensor
        return _learned_grid_qdq(tensor, encoding_min, encoding_max,
                                 bitwidth=self.bitwidth,
                                 symmetric=self.use_symmetric_encodings)


def tensor_quantizer_factory(bitwidth, round_mode, quant_scheme, use_symmetric_encodings,
                             enabled_by_default, data_type=QuantizationDataType.int):
    # Only the learned-grid (range-learning) quantizer is implemented here.
    return LearnedGridTensorQuantizer(bitwidth, round_mode, quant_scheme,
                                      use_symmetric_encodings, enabled_by_default,
                                      data_type=data_type)


class SimpleConv2d:
    """Minimal NCHW Conv2d + bias standing in for the wrapped nn.Module.
    Its own compute is delegated to XLA (lax.conv), exactly as the PyTorch wrapper
    delegates to `module_to_wrap`; the wrapper's own compute (QDQ) is Pallas."""

    def __init__(self, key, in_channels, out_channels, kernel_size, padding=1):
        kw, kb = jax.random.split(key)
        fan_in = in_channels * kernel_size * kernel_size
        self.params = {
            "weight": jax.random.normal(
                kw, (out_channels, in_channels, kernel_size, kernel_size),
                dtype=jnp.float32) / jnp.sqrt(float(fan_in)),
            "bias": 0.1 * jax.random.normal(kb, (out_channels,), dtype=jnp.float32),
        }
        self.padding = padding

    def named_parameters(self):
        return dict(self.params)

    def apply(self, params, x):
        y = jax.lax.conv_general_dilated(
            x, params["weight"], window_strides=(1, 1),
            padding=[(self.padding, self.padding)] * 2,
            dimension_numbers=("NCHW", "OIHW", "NCHW"))
        return y + params["bias"][None, :, None, None]

    def __call__(self, x):
        return self.apply(self.params, x)


class LearnedGridQuantWrapper:
    """JAX/Pallas re-implementation of aimet_torch's LearnedGridQuantWrapper forward."""

    def __init__(self, module_to_wrap, weight_bw, activation_bw, round_mode,
                 quant_scheme, is_output_quantized=True, is_symmetric=False,
                 num_inputs=1, num_outputs=1, data_type=QuantizationDataType.int):
        if data_type != QuantizationDataType.int:
            raise ValueError("Only QuantizationDataType.int is supported for "
                             "LearnedGridQuantWrapper")
        self._module_to_wrap = module_to_wrap
        self._mode = QcQuantizeOpMode.ANALYSIS
        self.output_quantizers = [
            tensor_quantizer_factory(activation_bw, round_mode, quant_scheme, is_symmetric,
                                     enabled_by_default=is_output_quantized,
                                     data_type=data_type)
            for _ in range(num_outputs)]
        self.output_quantizer = self.output_quantizers[0]
        self.input_quantizers = [
            tensor_quantizer_factory(activation_bw, round_mode, quant_scheme, is_symmetric,
                                     enabled_by_default=False, data_type=data_type)
            for _ in range(num_inputs)]
        self.input_quantizer = self.input_quantizers[0]
        self.param_quantizers = {
            name: tensor_quantizer_factory(weight_bw, round_mode, quant_scheme, is_symmetric,
                                           enabled_by_default=True, data_type=data_type)
            for name in module_to_wrap.named_parameters()}

        # Learnable encoding parameters (registered as None, seeded by TF init).
        self._parameters = {}
        for index in range(num_inputs):
            self._register_encoding_params("input" + str(index), self.input_quantizers[index])
        for index in range(num_outputs):
            self._register_encoding_params("output" + str(index), self.output_quantizers[index])
        for name in module_to_wrap.named_parameters():
            self._register_encoding_params(name, self.param_quantizers[name])

    def _register_encoding_params(self, name, quantizer):
        self._parameters[name + "_encoding_min"] = None
        self._parameters[name + "_encoding_max"] = None
        quantizer.name = name
        quantizer.wrapper_ref = self

    # ------------- QcQuantizeWrapper API (subset used by the forward) ------------- #
    def set_output_bw(self, output_bw):
        self.output_quantizers[0].bitwidth = output_bw

    def set_mode(self, mode):
        self._mode = mode

    def enable_param_quantizers(self, enabled, param_name_to_exclude=("bias",)):
        if not param_name_to_exclude:
            param_name_to_exclude = []
        for param_name, param_quantizer in self.param_quantizers.items():
            if param_name not in param_name_to_exclude:
                param_quantizer.enabled = enabled

    def enable_input_quantizers(self, enabled):
        for quantizer in self.input_quantizers:
            quantizer.enabled = enabled

    def enable_output_quantizers(self, enabled):
        for quantizer in self.output_quantizers:
            quantizer.enabled = enabled

    # ---------------- encoding initialization (TF init, Pallas min/max) ------------ #
    def initialize_encodings(self, *example_inputs):
        """training_range_learning_with_tf_init: seed the learnable encoding min/max
        from observed tensor ranges (Pallas partial min/max kernel), zero-anchored."""
        def seed(name, tensor):
            mn, mx = _tensor_min_max(tensor)
            mn = jnp.minimum(mn, 0.0).astype(jnp.float32)
            mx = jnp.maximum(jnp.maximum(mx, 0.0), mn + 1e-5).astype(jnp.float32)
            self._parameters[name + "_encoding_min"] = mn
            self._parameters[name + "_encoding_max"] = mx

        for index, tensor in enumerate(example_inputs):
            seed("input" + str(index), tensor)
        for name, param in self._module_to_wrap.named_parameters().items():
            seed(name, param)
        outputs = self._module_to_wrap(*example_inputs)
        if not isinstance(outputs, (tuple, list)):
            outputs = [outputs]
        for index, tensor in enumerate(outputs):
            seed("output" + str(index), tensor)

    # ------------------------- forward-pass pieces --------------------------------- #
    def apply_gating_logic(self):
        eps = jnp.float32(1e-5)

        def _apply_logic(name):
            enc_min = self._parameters[name + "_encoding_min"]
            enc_max = self._parameters[name + "_encoding_max"]
            assert enc_min is not None and enc_max is not None, (
                "Encodings not initialized; call initialize_encodings(*inputs) first")
            enc_min = jnp.minimum(jnp.float32(0.0), enc_min)
            enc_max = jnp.maximum(jnp.float32(0.0), enc_max)
            enc_max = jnp.maximum(enc_max, enc_min + eps)
            self._parameters[name + "_encoding_min"] = enc_min
            self._parameters[name + "_encoding_max"] = enc_max

        for index, input_quantizer in enumerate(self.input_quantizers):
            if input_quantizer.enabled:
                _apply_logic("input" + str(index))
        for index, output_quantizer in enumerate(self.output_quantizers):
            if output_quantizer.enabled:
                _apply_logic("output" + str(index))
        for name in self._module_to_wrap.named_parameters():
            if self.param_quantizers[name].enabled:
                _apply_logic(name)

    def _quantize_params(self):
        """ParameterQuantizer.apply equivalent: QDQ each enabled parameter.
        (Functional JAX: no shadow-param save/restore required.)"""
        quantized = {}
        for name, param in self._module_to_wrap.named_parameters().items():
            quantizer = self.param_quantizers[name]
            if quantizer.enabled:
                quantized[name] = quantizer.quantize_dequantize(
                    param,
                    self._parameters[name + "_encoding_min"],
                    self._parameters[name + "_encoding_max"])
            else:
                quantized[name] = param
        return quantized

    def _quantize_activation(self, tensors_to_quantize, tensor_quantizers, type_of_quantizer):
        quantized_tensors = []
        for index, tensor_to_quantize in enumerate(tensors_to_quantize):
            assert len(tensor_quantizers) > index, "Not enough tensor quantizers allocated"
            if not jnp.issubdtype(tensor_to_quantize.dtype, jnp.floating):
                # dtypes ignored for quantization (ints / bools pass through)
                quantized_tensors.append(tensor_to_quantize)
                continue
            encoding_min = self._parameters[type_of_quantizer + str(index) + "_encoding_min"]
            encoding_max = self._parameters[type_of_quantizer + str(index) + "_encoding_max"]
            quantized_tensors.append(tensor_quantizers[index].quantize_dequantize(
                tensor_to_quantize, encoding_min, encoding_max))
        if len(quantized_tensors) == 1:
            quantized_tensors = quantized_tensors[0]
        return quantized_tensors

    def forward(self, *inputs):
        self.apply_gating_logic()
        quantized_inputs = self._quantize_activation(
            list(inputs), self.input_quantizers, "input")
        if not isinstance(quantized_inputs, list):
            quantized_inputs = [quantized_inputs]
        quantized_params = self._quantize_params()
        wrapped_output = self._module_to_wrap.apply(quantized_params, *quantized_inputs)
        if not isinstance(wrapped_output, (tuple, list)):
            wrapped_output = [wrapped_output]
        output = self._quantize_activation(
            list(wrapped_output), self.output_quantizers, "output")
        return output

    __call__ = forward


# --------------------------- pure-JAX reference (tests) ---------------------------- #

def _reference_qdq(x, enc_min, enc_max, bitwidth, symmetric):
    delta, offset, qmin, qmax = _encoding_params(enc_min, enc_max, bitwidth, symmetric)
    inv_delta = 1.0 / delta
    q = jnp.clip(jnp.round(x.astype(jnp.float32) * inv_delta) - offset, qmin, qmax)
    return ((q + offset) * delta).astype(x.dtype)


def _reference_forward(wrapper, x):
    """Pure-jnp replica of the wrapper forward pass (no Pallas), for verification."""
    def gated(name):
        emin = jnp.minimum(0.0, wrapper._parameters[name + "_encoding_min"])
        emax = jnp.maximum(0.0, wrapper._parameters[name + "_encoding_max"])
        return emin, jnp.maximum(emax, emin + 1e-5)

    xin = x
    tq = wrapper.input_quantizers[0]
    if tq.enabled:
        emin, emax = gated("input0")
        xin = _reference_qdq(xin, emin, emax, tq.bitwidth, tq.use_symmetric_encodings)
    qparams = {}
    for name, param in wrapper._module_to_wrap.named_parameters().items():
        tq = wrapper.param_quantizers[name]
        if tq.enabled:
            emin, emax = gated(name)
            qparams[name] = _reference_qdq(param, emin, emax, tq.bitwidth,
                                           tq.use_symmetric_encodings)
        else:
            qparams[name] = param
    y = wrapper._module_to_wrap.apply(qparams, xin)
    tq = wrapper.output_quantizers[0]
    if tq.enabled:
        emin, emax = gated("output0")
        y = _reference_qdq(y, emin, emax, tq.bitwidth, tq.use_symmetric_encodings)
    return y


# ----------------------------------- main ------------------------------------------ #

if __name__ == "__main__":
    key = jax.random.PRNGKey(0)
    k_x, k_m, k_big = jax.random.split(key, 3)

    # NCHW activation, small wrapped module: Conv2d(4 -> 8, 3x3, pad 1)
    x = jax.random.normal(k_x, (2, 4, 16, 16), dtype=jnp.float32)
    conv = SimpleConv2d(k_m, in_channels=4, out_channels=8, kernel_size=3, padding=1)

    wrapper = LearnedGridQuantWrapper(
        conv, weight_bw=8, activation_bw=8, round_mode="nearest",
        quant_scheme=QuantScheme.training_range_learning_with_tf_init,
        is_output_quantized=True, is_symmetric=False)

    # TF-init of the learnable encoding min/max (Pallas min/max kernel).
    wrapper.initialize_encodings(x)

    # sanity: Pallas min/max matches jnp on an un-padded tensor
    mn, mx = _tensor_min_max(x)
    jax.block_until_ready((mn, mx))
    assert abs(float(mn) - float(jnp.min(x))) < 1e-6
    assert abs(float(mx) - float(jnp.max(x))) < 1e-6

    # forward: gate encodings -> (inputs pass through; input quantizer disabled by
    # default) -> QDQ params -> wrapped conv -> QDQ output
    y = wrapper(x)
    jax.block_until_ready(y)
    assert y.shape == (2, 8, 16, 16) and y.dtype == x.dtype

    # matches a pure-JAX reference implementation of the same forward
    y_ref = _reference_forward(wrapper, x)
    jax.block_until_ready(y_ref)
    assert float(jnp.max(jnp.abs(y - y_ref))) <= 1e-4

    # exercise the large lane-dense tile path ((512, 1024) f32 blocks, grid = 2)
    x_big = jax.random.normal(k_big, (256, 4096), dtype=jnp.float32)
    mn_b, mx_b = _tensor_min_max(x_big)
    jax.block_until_ready((mn_b, mx_b))
    assert abs(float(mn_b) - float(jnp.min(x_big))) < 1e-6
    assert abs(float(mx_b) - float(jnp.max(x_big))) < 1e-6
    qdq_big = _learned_grid_qdq(x_big, mn_b, mx_b, bitwidth=8, symmetric=False)
    jax.block_until_ready(qdq_big)
    assert float(jnp.max(jnp.abs(
        qdq_big - _reference_qdq(x_big, mn_b, mx_b, 8, False)))) <= 1e-4
    delta_b = float((mx_b - mn_b) / 255.0)
    assert float(jnp.max(jnp.abs(qdq_big - x_big))) <= 0.51 * delta_b + 1e-6

    print("KERNEL_OK")
</pallas_src>

<mosaic_0001>
module attributes {stable_mosaic.version = 11 : i64} {
  func.func @_minmax_kernel(%arg0: i32, %arg1: memref<8x128xf32, #tpu.memory_space<vmem>>, %arg2: memref<8x128xf32, #tpu.memory_space<vmem>>, %arg3: memref<8x128xf32, #tpu.memory_space<vmem>>) attributes {dimension_semantics = [#tpu.dimension_semantics<parallel>], iteration_bounds = array<i64: 2>, scalar_prefetch = 0 : i64, scratch_operands = 0 : i64, tpu.core_type = #tpu.core_type<tc>, window_params = [{transform_indices = @transform_0, window_bounds = array<i64: 8, 128>}, {transform_indices = @transform_1, window_bounds = array<i64: 8, 128>}, {transform_indices = @transform_2, window_bounds = array<i64: 8, 128>}]} {
    %c0 = arith.constant 0 : index
    %c0_0 = arith.constant 0 : index
    %0 = vector.load %arg1[%c0, %c0_0] : memref<8x128xf32, #tpu.memory_space<vmem>>, vector<8x128xf32>
    %cst = arith.constant dense<0x7F800000> : vector<128xf32>
    %1 = vector.multi_reduction <minimumf>, %0, %cst [0] : vector<8x128xf32> to vector<128xf32>
    %2 = vector.shape_cast %1 : vector<128xf32> to vector<1x128xf32>
    %cst_1 = arith.constant dense<0xFF800000> : vector<128xf32>
    %3 = vector.multi_reduction <maximumf>, %0, %cst_1 [0] : vector<8x128xf32> to vector<128xf32>
    %4 = vector.shape_cast %3 : vector<128xf32> to vector<1x128xf32>
    %5 = vector.shape_cast %2 : vector<1x128xf32> to vector<1x128xf32>
    %6 = vector.broadcast %5 : vector<1x128xf32> to vector<8x128xf32>
    %c0_2 = arith.constant 0 : index
    %c0_3 = arith.constant 0 : index
    %7 = vector.load %arg2[%c0_2, %c0_3] : memref<8x128xf32, #tpu.memory_space<vmem>>, vector<8x128xf32>
    tpu.vector_store %arg2[%c0_2, %c0_3], %6 {strides = array<i32>} : memref<8x128xf32, #tpu.memory_space<vmem>>, vector<8x128xf32>,
    %8 = vector.shape_cast %4 : vector<1x128xf32> to vector<1x128xf32>
    %9 = vector.broadcast %8 : vector<1x128xf32> to vector<8x128xf32>
    %c0_4 = arith.constant 0 : index
    %c0_5 = arith.constant 0 : index
    %10 = vector.load %arg3[%c0_4, %c0_5] : memref<8x128xf32, #tpu.memory_space<vmem>>, vector<8x128xf32>
    tpu.vector_store %arg3[%c0_4, %c0_5], %9 {strides = array<i32>} : memref<8x128xf32, #tpu.memory_space<vmem>>, vector<8x128xf32>,
    return
  }
  func.func @transform_0(%arg0: i32) -> (i32, i32) {
    %c0_i32 = arith.constant 0 : i32
    %c0_i32_0 = arith.constant 0 : i32
    return %arg0, %c0_i32 : i32, i32
  }
  func.func @transform_1(%arg0: i32) -> (i32, i32) {
    %c0_i32 = arith.constant 0 : i32
    %c0_i32_0 = arith.constant 0 : i32
    return %arg0, %c0_i32 : i32, i32
  }
  func.func @transform_2(%arg0: i32) -> (i32, i32) {
    %c0_i32 = arith.constant 0 : i32
    %c0_i32_0 = arith.constant 0 : i32
    return %arg0, %c0_i32 : i32, i32
  }
}

</mosaic_0001>

<bundles_post_ra>
// kernel: _tensor_min_max.1
= control target key start
LH: loop header
LB: loop body
LE: loop exit
PB: predicated region body
PF: predicated region fallthrough
CT: control target
= control target key end

     0   :  { %s290_s9 = smov 0   ;;  %s310_s0 = inlined_call_operand.vmem [shape: f32[16,128], index: 0, kind: input, shape index: {}]   ;;  %s311_s1 = inlined_call_operand.vmem [shape: f32[16,128], index: 1, kind: output, shape index: {0}]   ;;  %s312_s2 = inlined_call_operand.vmem [shape: f32[16,128], index: 2, kind: output, shape index: {1}]  }
   0x1 LB: > { %s249_s10 = sadd.s32 4294967295, %s273_s9   ;;  %p253_p0 = scmp.ge.s32.totalorder %s273_s9, 1  ;;  %s273_s9 = sphi %s290_s9, %s13_s9  }
   0x2   : > { %p114_p1 = scmp.lt.s32.totalorder %s273_s9, 3 }
   0x4   : > { %p115_p2 = pnand %p253_p0, %p114_p1 }
   0x5   : > { %p138_p3 = scmp.lt.s32.totalorder (!%p115_p2), %s249_s10, 1 }
   0x6   : > { %118 = sbr.rel (%p115_p2) target bundleno = 29 (0x1d), region = 24 }
   0xb   : > { %s314_s10 = smov (!%p138_p3, %s249_s10), 1 }
   0xc   : > { %s254_s11 = sshll.u32 %s314_s10, 3 }
   0xd   : > { %s141_s14 = scalar_lea.vmem %s310_s0, %s254_s11  ;;  %s145_s17 = scalar_lea.vmem %s311_s1, %s254_s11 }
   0xe   : > { %v150_v0 = vld [vmem:[%s141_s14] sm:$0xff]  ;;  %s149_s20 = scalar_lea.vmem %s312_s2, %s254_s11 }
   0xf   : > { %v151_v1 = vrot.slane %v150_v0, 4 }
  0x11   : > { %v152_v2 = vmin.f32 %v150_v0, %v151_v1  ;;  %v158_v3 = vmax.f32 %v150_v0, %v151_v1 }
  0x13   : > { %v153_v4 = vrot.slane %v152_v2, 2  ;;  %v159_v5 = vrot.slane %v158_v3, 2 }
  0x15   : > { %v154_v6 = vmin.f32 %v152_v2, %v153_v4  ;;  %v160_v7 = vmax.f32 %v158_v3, %v159_v5 }
  0x17   : > { %v155_v8 = vrot.slane %v154_v6, 1  ;;  %v161_v9 = vrot.slane %v160_v7, 1 }
  0x19   : > { %v156_v10 = vmin.f32 %v154_v6, %v155_v8  ;;  %v162_v11 = vmax.f32 %v160_v7, %v161_v9 }
  0x1b   : > { %163 = vst [vmem:[%s145_s17] sm:$0xff] %v156_v10 }
  0x1c   : > { %164 = vst [vmem:[%s149_s20] sm:$0xff] %v162_v11 }
  0x1d PF: > { %s13_s9 = sadd.s32 1, %s273_s9  }
  0x1e   : > { %p10_p4 = scmp.ge.s32.totalorder %s13_s9, 4  }
  0x20   :  { %12 = sbr.rel (!%p10_p4) target bundleno = 1 (0x1), region = 66 }

</bundles_post_ra>
